<compile_context>
chip_gen: v7x
topology: tpu7x:2x2x1
jax: 0.10.0
libtpu: 0.0.40
codegen_flags: <defaults>
</compile_context>

<pallas_src>
import math

import jax
import jax.numpy as jnp
import numpy as np
from jax import lax
from jax.experimental import pallas as pl
from jax.experimental.pallas import tpu as pltpu

EPS = 1e-4  # TimeStepNorm default eps


def _round_up(x, m):
    return ((x + m - 1) // m) * m


# ---------------------------------------------------------------------------
# Pallas kernel
# ---------------------------------------------------------------------------
def _build_convnet_stage_kernel(n_extra_layers: int, eps: float, approx_inv_std: bool):
    """Ref order:
         slopes (SMEM scalar-prefetch),
         xg, W1, b1, [W_ext, b_ext, gamma, beta] * n_extra_layers, out
       All tensors use (channels, time) layout; time (lanes) is the tiled axis.
       Each 1x1 weight W_ext has one extra row = column-means of W (and b_ext one
       extra entry = mean(b)) so the MXU produces the TimeStepNorm channel mean.
    """

    def kernel(slopes_ref, xg_ref, w1_ref, b1_ref, *rest):
        o_ref = rest[-1]
        lrefs = rest[:-1]

        x = xg_ref[0]                                   # (C*K, TT)
        # Head Conv1d(kernel=K, stride=dec_by, padding=K-1) == matmul against
        # the strided/flattened taps (gathered lane-dense in the wrapper).
        h = jnp.dot(w1_ref[...], x, preferred_element_type=jnp.float32) + b1_ref[...]
        a = slopes_ref[0]
        h = jnp.where(h >= 0, h, a * h)                 # PReLU (shared slope)

        for i in range(n_extra_layers):
            w = lrefs[4 * i][...]                       # (H+1, H_prev); last row = col-means
            b = lrefs[4 * i + 1][...]                   # (H+1, 1);  last entry = mean(bias)
            g = lrefs[4 * i + 2][...]                   # (H, 1) gamma
            bt = lrefs[4 * i + 3][...]                  # (H, 1) beta
            a = slopes_ref[i + 1]
            H = w.shape[0] - 1

            # 1x1 Conv1d == pointwise matmul over channels (f32 accumulation).
            full = jnp.dot(w, h.astype(w.dtype), preferred_element_type=jnp.float32) + b
            h = full[:H]                                # (H, TT) conv output
            mean = full[H:]                             # (1, TT) channel mean, free from MXU

            # TimeStepNorm (one-pass moments): var = E[h^2] - mean^2, clamped >= 0
            # to guard against cancellation; std is population std (unbiased=False),
            # eps added to std as in the reference module.
            sq_mean = jnp.mean(h * h, axis=0, keepdims=True)        # (1, TT)
            var = jnp.maximum(sq_mean - mean * mean, 0.0)
            inv = pl.reciprocal(jnp.sqrt(var) + eps, approx=approx_inv_std)
            h = (h - mean) * inv
            h = g * h + bt

            h = jnp.where(h >= 0, h, a * h)             # PReLU
            # Dropout(p=0.2): identity (eval mode).

        o_ref[0] = h.astype(o_ref.dtype)

    return kernel


# ---------------------------------------------------------------------------
# Wrapper: strided tap slices + tiled pallas_call
# ---------------------------------------------------------------------------
def convnet_stage_forward(x, params, *, fifo_len, dec_by, eps=EPS,
                          compute_dtype=jnp.bfloat16, out_dtype=jnp.float32,
                          tile_t=None, approx_inv_std=True,
                          single_buffer_weights=True):
    """x: (N, C_in, L) float32, PyTorch NCL layout. Returns (N, H_last, L_out)."""
    N, C, L = x.shape
    K, s = fifo_len, dec_by
    L_out = (L + 2 * (K - 1) - K) // s + 1

    # ---- im2col taps via K strided slices (no gather HLO), channels-first /
    # time-last so the kernel input is already lane-dense:
    #   xg[n, c*K + k, t] = x_pad[n, c, t*s + k]
    x_pad = jnp.pad(x, ((0, 0), (0, 0), (K - 1, K - 1)))
    taps = [lax.slice(x_pad, (0, 0, k), (N, C, k + (L_out - 1) * s + 1), (1, 1, s))
            for k in range(K)]
    xg = jnp.stack(taps, axis=2).reshape(N, C * K, L_out).astype(compute_dtype)

    # ---- short-sequence mode: fold batch into the time (lane) axis when that
    # strictly reduces padded columns.  All post-gather ops are per-time-step,
    # so tiles may span batches.
    fold_batch = (N > 1) and (_round_up(N * L_out, 128) < N * _round_up(L_out, 128))
    if fold_batch:
        xg = jnp.transpose(xg, (1, 0, 2)).reshape(1, C * K, N * L_out)
    N_eff = 1 if fold_batch else N
    L_total = N * L_out if fold_batch else L_out

    # ---- weights (channels-on-sublanes); 1x1 weights get an extra mean-row so
    # the MXU emits the TimeStepNorm channel mean for free.
    (W1, b1, a1) = params[0]
    H0 = W1.shape[0]
    w1_flat = W1.reshape(H0, C * K).astype(compute_dtype)        # (H0, C*K), c*K+k order

    slopes = [jnp.asarray(a1, jnp.float32)]
    weight_args = [w1_flat, b1.reshape(H0, 1).astype(jnp.float32)]
    weight_shapes = [(H0, C * K), (H0, 1)]
    h_dims = [H0]
    H_last = H0
    for (W, b, g, bt, a) in params[1:]:
        H_prev, H_last = W.shape[1], W.shape[0]
        Wc = W.astype(compute_dtype)
        w_mean = jnp.mean(Wc.astype(jnp.float32), axis=0, keepdims=True).astype(compute_dtype)
        W_ext = jnp.concatenate([Wc, w_mean], axis=0)            # (H+1, H_prev)
        b_ext = jnp.concatenate([b, jnp.mean(b, keepdims=True)]).reshape(H_last + 1, 1)
        weight_args += [W_ext,
                        b_ext.astype(jnp.float32),
                        g.reshape(H_last, 1).astype(jnp.float32),
                        bt.reshape(H_last, 1).astype(jnp.float32)]
        weight_shapes += [(H_last + 1, H_prev), (H_last + 1, 1),
                          (H_last, 1), (H_last, 1)]
        slopes.append(jnp.asarray(a, jnp.float32))
        h_dims.append(H_last)
    slopes = jnp.stack(slopes)                                   # (n_layers,) -> SMEM

    # ---- time-tile size & explicit VMEM budget.
    in_elt = jnp.dtype(compute_dtype).itemsize
    out_elt = jnp.dtype(out_dtype).itemsize
    weight_bytes = sum(int(a.size) * a.dtype.itemsize for a in weight_args)
    max_h = max(h_dims) + 1
    # Per time column: double-buffered input tile + double-buffered output tile
    # + generous allowance for the f32 intermediates of the widest layer.
    per_col = 2 * C * K * in_elt + 2 * H_last * out_elt + 8 * max_h * 4

    try:  # physical VMEM of the attached chip; conservative v7x figure otherwise
        phys_vmem = int(pltpu.get_tpu_info().vmem_capacity_bytes)
    except Exception:
        phys_vmem = 64 * 1024 * 1024
    pipeline_budget = int(phys_vmem * 0.6) - weight_bytes - (2 << 20)

    if tile_t is None:
        cap = max(128, (max(pipeline_budget, 0) // per_col) // 128 * 128)
        tile_t = min(4096, _round_up(L_total, 128), cap)
    tile_t = max(128, _round_up(tile_t, 128))

    # v7x megacore: guarantee >= 2 grid steps when the data allows it.
    total_cols = _round_up(L_total, 128)
    if N_eff == 1 and tile_t >= total_cols and total_cols > 128:
        tile_t = max(128, _round_up(total_cols // 2, 128))

    L_pad = _round_up(L_total, tile_t)
    xg = jnp.pad(xg, ((0, 0), (0, 0), (0, L_pad - L_total)))

    vmem_limit = int(min(phys_vmem * 9 // 10,
                         max(32 << 20, per_col * tile_t + weight_bytes + (4 << 20))))

    # ---- BlockSpecs
    def tile_map(n, t, _slopes):        # index maps receive the scalar-prefetch ref
        return (n, 0, t)

    def const_map(n, t, _slopes):       # weights/bias stay resident (constant block)
        return (0, 0)

    def _const_spec(shape):
        if single_buffer_weights:
            # Constant blocks are never re-DMA'd -> single-buffer them to halve
            # their resident VMEM (matters on v7x with production-sized layers).
            return pl.BlockSpec(shape, const_map, pipeline_mode=pl.Buffered(1))
        return pl.BlockSpec(shape, const_map)

    in_specs = [pl.BlockSpec((1, C * K, tile_t), tile_map)]      # activations (dbl-buffered)
    in_specs += [_const_spec(shape) for shape in weight_shapes]
    # Note: bump the xg spec to pl.Buffered(3) only if a trace shows exposed input DMA.

    kernel = _build_convnet_stage_kernel(len(params) - 1, eps, approx_inv_std)

    out = pl.pallas_call(
        kernel,
        out_shape=jax.ShapeDtypeStruct((N_eff, H_last, L_pad), out_dtype),
        grid_spec=pltpu.PrefetchScalarGridSpec(
            num_scalar_prefetch=1,
            grid=(N_eff, L_pad // tile_t),
            in_specs=in_specs,
            out_specs=pl.BlockSpec((1, H_last, tile_t), tile_map),
        ),
        compiler_params=pltpu.CompilerParams(
            dimension_semantics=("parallel", "parallel"),
            vmem_limit_bytes=vmem_limit),
    )(slopes, xg, *weight_args)

    # Drop time padding; un-fold the batch if it was folded into the lane axis.
    if fold_batch:
        out = out[0, :, :N * L_out].reshape(H_last, N, L_out)
        return jnp.transpose(out, (1, 0, 2))
    return out[:, :, :L_out]


# ---------------------------------------------------------------------------
# Deterministic parameter init (shapes match the nn.Module's __init__)
# ---------------------------------------------------------------------------
def init_params(key, input_dim, fifo_len, hidden_dims):
    params = []
    kw, kb, key = jax.random.split(key, 3)
    fan_in = input_dim * fifo_len
    W1 = jax.random.normal(kw, (hidden_dims[0], input_dim, fifo_len), jnp.float32) / math.sqrt(fan_in)
    b1 = 0.01 * jax.random.normal(kb, (hidden_dims[0],), jnp.float32)
    a1 = jnp.float32(0.25)                               # PReLU default init
    params.append((W1, b1, a1))
    for i in range(1, len(hidden_dims)):
        kw, kb, key = jax.random.split(key, 3)
        W = jax.random.normal(kw, (hidden_dims[i], hidden_dims[i - 1]), jnp.float32) / math.sqrt(hidden_dims[i - 1])
        b = 0.01 * jax.random.normal(kb, (hidden_dims[i],), jnp.float32)
        g = jnp.ones((hidden_dims[i],), jnp.float32)      # TimeStepNorm gamma
        bt = jnp.zeros((hidden_dims[i],), jnp.float32)    # TimeStepNorm beta
        a = jnp.float32(0.25)                             # PReLU default init
        params.append((W, b, g, bt, a))
    return params


# ---------------------------------------------------------------------------
# Pure-JAX reference (independent of the kernel) for correctness checking
# ---------------------------------------------------------------------------
def reference_forward(x, params, fifo_len, dec_by, eps=EPS):
    (W1, b1, a1) = params[0]
    y = jax.lax.conv_general_dilated(
        x, W1, window_strides=(dec_by,), padding=[(fifo_len - 1, fifo_len - 1)],
        dimension_numbers=("NCH", "OIH", "NCH"))
    y = y + b1[None, :, None]
    y = jnp.where(y >= 0, y, a1 * y)
    for (W, b, g, bt, a) in params[1:]:
        y = jnp.einsum("oi,nil->nol", W, y) + b[None, :, None]
        mean = jnp.mean(y, axis=1, keepdims=True)
        std = jnp.sqrt(jnp.mean((y - mean) ** 2, axis=1, keepdims=True))
        y = (y - mean) / (std + eps)
        y = g[None, :, None] * y + bt[None, :, None]
        y = jnp.where(y >= 0, y, a * y)
    return y


if __name__ == "__main__":
    # small shapes consistent with the module's forward (N, C_in, L)
    N, input_dim, L = 2, 4, 16
    fifo_len, dec_by = 4, 2
    hidden_dims = [32, 32]

    key = jax.random.PRNGKey(0)
    kx, kp = jax.random.split(key)
    x = jax.random.normal(kx, (N, input_dim, L), jnp.float32)   # PyTorch NCL input
    params = init_params(kp, input_dim, fifo_len, hidden_dims)
    ref = reference_forward(x, params, fifo_len, dec_by)

    fwd = jax.jit(convnet_stage_forward,
                  static_argnames=("fifo_len", "dec_by", "eps", "compute_dtype",
                                   "out_dtype", "tile_t", "approx_inv_std",
                                   "single_buffer_weights"))

    def run(**kw):
        return jax.block_until_ready(
            fwd(x, params, fifo_len=fifo_len, dec_by=dec_by, **kw))

    try:
        # f32 operands + exact inverse std: tight check against the reference.
        out_f32 = run(compute_dtype=jnp.float32, approx_inv_std=False)
        # bf16 operands (fast MXU path) + approx (EUP) inverse std.
        out_bf16 = run()
    except Exception:
        # Defensive fallback: if this JAX build rejects BlockSpec(pipeline_mode=
        # pl.Buffered(1)) for the resident weight blocks, rerun with the default
        # double-buffered constant blocks (identical semantics).
        out_f32 = run(compute_dtype=jnp.float32, approx_inv_std=False,
                      single_buffer_weights=False)
        out_bf16 = run(single_buffer_weights=False)

    np.testing.assert_allclose(np.asarray(out_f32), np.asarray(ref), rtol=1e-4, atol=1e-4)
    # bf16 operand rounding costs ~2-3 decimal digits on the normalized
    # activations, hence the looser tolerance for the fast path.
    np.testing.assert_allclose(np.asarray(out_bf16), np.asarray(ref), rtol=5e-2, atol=5e-2)

    print("KERNEL_OK")
</pallas_src>

<mosaic_0001>
module attributes {stable_mosaic.version = 11 : i64} {
  func.func @kernel(%arg0: i32, %arg1: i32, %arg2: memref<2xf32, #tpu.memory_space<smem>>, %arg3: memref<1x16x128xf32, #tpu.memory_space<vmem>>, %arg4: memref<32x16xf32, #tpu.memory_space<vmem>>, %arg5: memref<32x1xf32, #tpu.memory_space<vmem>>, %arg6: memref<33x32xf32, #tpu.memory_space<vmem>>, %arg7: memref<33x1xf32, #tpu.memory_space<vmem>>, %arg8: memref<32x1xf32, #tpu.memory_space<vmem>>, %arg9: memref<32x1xf32, #tpu.memory_space<vmem>>, %arg10: memref<1x32x128xf32, #tpu.memory_space<vmem>>) attributes {dimension_semantics = [#tpu.dimension_semantics<parallel>, #tpu.dimension_semantics<parallel>], iteration_bounds = array<i64: 1, 1>, scalar_prefetch = 1 : i64, scratch_operands = 0 : i64, tpu.core_type = #tpu.core_type<tc>, window_params = [{transform_indices = @transform_0, window_bounds = array<i64: 1, 16, 128>}, {pipeline_mode = #tpu.pipeline_mode<synchronous>, transform_indices = @transform_1, window_bounds = array<i64: 32, 16>}, {pipeline_mode = #tpu.pipeline_mode<synchronous>, transform_indices = @transform_2, window_bounds = array<i64: 32, 1>}, {pipeline_mode = #tpu.pipeline_mode<synchronous>, transform_indices = @transform_3, window_bounds = array<i64: 33, 32>}, {pipeline_mode = #tpu.pipeline_mode<synchronous>, transform_indices = @transform_4, window_bounds = array<i64: 33, 1>}, {pipeline_mode = #tpu.pipeline_mode<synchronous>, transform_indices = @transform_5, window_bounds = array<i64: 32, 1>}, {pipeline_mode = #tpu.pipeline_mode<synchronous>, transform_indices = @transform_6, window_bounds = array<i64: 32, 1>}, {transform_indices = @transform_7, window_bounds = array<i64: 1, 32, 128>}]} {
    %c0 = arith.constant 0 : index
    %c0_0 = arith.constant 0 : index
    %c0_1 = arith.constant 0 : index
    %0 = vector.load %arg3[%c0, %c0_0, %c0_1] : memref<1x16x128xf32, #tpu.memory_space<vmem>>, vector<1x16x128xf32>
    %1 = vector.shape_cast %0 : vector<1x16x128xf32> to vector<16x128xf32>
    %c0_2 = arith.constant 0 : index
    %c0_3 = arith.constant 0 : index
    %2 = vector.load %arg4[%c0_2, %c0_3] : memref<32x16xf32, #tpu.memory_space<vmem>>, vector<32x16xf32>
    %cst = arith.constant dense<0.000000e+00> : vector<32x128xf32>
    %3 = tpu.matmul %2, %1, %cst {dimension_numbers = #tpu.dot_dimension_numbers<[1], [0], [0], [1], [0, 0, 1, 1], [], []>} : vector<32x16xf32>, vector<16x128xf32>, vector<32x128xf32> -> vector<32x128xf32>
    %c0_4 = arith.constant 0 : index
    %c0_5 = arith.constant 0 : index
    %4 = vector.load %arg5[%c0_4, %c0_5] : memref<32x1xf32, #tpu.memory_space<vmem>>, vector<32x1xf32>
    %5 = vector.broadcast %4 : vector<32x1xf32> to vector<32x128xf32>
    %6 = arith.addf %3, %5 : vector<32x128xf32>
    %c0_6 = arith.constant 0 : index
    %7 = memref.load %arg2[%c0_6] : memref<2xf32, #tpu.memory_space<smem>>
    %cst_7 = arith.constant 0.000000e+00 : f32
    %8 = vector.broadcast %cst_7 : f32 to vector<32x128xf32>
    %9 = arith.cmpf oge, %6, %8 : vector<32x128xf32>
    %10 = vector.broadcast %7 : f32 to vector<32x128xf32>
    %11 = arith.mulf %10, %6 : vector<32x128xf32>
    %12 = arith.select %9, %6, %11 : vector<32x128xi1>, vector<32x128xf32>
    %c0_8 = arith.constant 0 : index
    %c0_9 = arith.constant 0 : index
    %13 = vector.load %arg6[%c0_8, %c0_9] : memref<33x32xf32, #tpu.memory_space<vmem>>, vector<33x32xf32>
    %c0_10 = arith.constant 0 : index
    %c0_11 = arith.constant 0 : index
    %14 = vector.load %arg7[%c0_10, %c0_11] : memref<33x1xf32, #tpu.memory_space<vmem>>, vector<33x1xf32>
    %c0_12 = arith.constant 0 : index
    %c0_13 = arith.constant 0 : index
    %15 = vector.load %arg8[%c0_12, %c0_13] : memref<32x1xf32, #tpu.memory_space<vmem>>, vector<32x1xf32>
    %c0_14 = arith.constant 0 : index
    %c0_15 = arith.constant 0 : index
    %16 = vector.load %arg9[%c0_14, %c0_15] : memref<32x1xf32, #tpu.memory_space<vmem>>, vector<32x1xf32>
    %c1 = arith.constant 1 : index
    %17 = memref.load %arg2[%c1] : memref<2xf32, #tpu.memory_space<smem>>
    %cst_16 = arith.constant dense<0.000000e+00> : vector<33x128xf32>
    %18 = tpu.matmul %13, %12, %cst_16 {dimension_numbers = #tpu.dot_dimension_numbers<[1], [0], [0], [1], [0, 0, 1, 1], [], []>} : vector<33x32xf32>, vector<32x128xf32>, vector<33x128xf32> -> vector<33x128xf32>
    %19 = vector.broadcast %14 : vector<33x1xf32> to vector<33x128xf32>
    %20 = arith.addf %18, %19 : vector<33x128xf32>
    %21 = vector.extract_strided_slice %20 {offsets = [0, 0], sizes = [32, 128], strides = [1, 1]} : vector<33x128xf32> to vector<32x128xf32>
    %22 = vector.extract_strided_slice %20 {offsets = [32, 0], sizes = [1, 128], strides = [1, 1]} : vector<33x128xf32> to vector<1x128xf32>
    %23 = arith.mulf %21, %21 : vector<32x128xf32>
    %cst_17 = arith.constant dense<0.000000e+00> : vector<128xf32>
    %24 = vector.multi_reduction <add>, %23, %cst_17 [0] : vector<32x128xf32> to vector<128xf32>
    %25 = vector.shape_cast %24 : vector<128xf32> to vector<1x128xf32>
    %cst_18 = arith.constant 3.200000e+01 : f32
    %26 = vector.broadcast %cst_18 : f32 to vector<1x128xf32>
    %27 = arith.divf %25, %26 : vector<1x128xf32>
    %28 = arith.mulf %22, %22 : vector<1x128xf32>
    %29 = arith.subf %27, %28 : vector<1x128xf32>
    %cst_19 = arith.constant 0.000000e+00 : f32
    %30 = vector.broadcast %cst_19 : f32 to vector<1x128xf32>
    %31 = arith.maximumf %29, %30 : vector<1x128xf32>
    %32 = math.sqrt %31 : vector<1x128xf32>
    %cst_20 = arith.constant 9.99999974E-5 : f32
    %33 = vector.broadcast %cst_20 : f32 to vector<1x128xf32>
    %34 = arith.addf %32, %33 : vector<1x128xf32>
    %35 = tpu.reciprocal %34 : vector<1x128xf32> -> vector<1x128xf32>
    %36 = vector.broadcast %22 : vector<1x128xf32> to vector<32x128xf32>
    %37 = arith.subf %21, %36 : vector<32x128xf32>
    %38 = vector.broadcast %35 : vector<1x128xf32> to vector<32x128xf32>
    %39 = arith.mulf %37, %38 : vector<32x128xf32>
    %40 = vector.broadcast %15 : vector<32x1xf32> to vector<32x128xf32>
    %41 = arith.mulf %40, %39 : vector<32x128xf32>
    %42 = vector.broadcast %16 : vector<32x1xf32> to vector<32x128xf32>
    %43 = arith.addf %41, %42 : vector<32x128xf32>
    %cst_21 = arith.constant 0.000000e+00 : f32
    %44 = vector.broadcast %cst_21 : f32 to vector<32x128xf32>
    %45 = arith.cmpf oge, %43, %44 : vector<32x128xf32>
    %46 = vector.broadcast %17 : f32 to vector<32x128xf32>
    %47 = arith.mulf %46, %43 : vector<32x128xf32>
    %48 = arith.select %45, %43, %47 : vector<32x128xi1>, vector<32x128xf32>
    %c0_22 = arith.constant 0 : index
    %c0_23 = arith.constant 0 : index
    %c0_24 = arith.constant 0 : index
    %49 = vector.load %arg10[%c0_22, %c0_23, %c0_24] : memref<1x32x128xf32, #tpu.memory_space<vmem>>, vector<1x32x128xf32>
    %50 = vector.shape_cast %49 : vector<1x32x128xf32> to vector<32x128xf32>
    %51 = vector.shape_cast %48 : vector<32x128xf32> to vector<1x32x128xf32>
    tpu.vector_store %arg10[%c0_22, %c0_23, %c0_24], %51 {strides = array<i32>} : memref<1x32x128xf32, #tpu.memory_space<vmem>>, vector<1x32x128xf32>,
    return
  }
  func.func @transform_0(%arg0: i32, %arg1: i32, %arg2: memref<2xf32, #tpu.memory_space<smem>>) -> (i32, i32, i32) {
    %c0_i32 = arith.constant 0 : i32
    %c0_i32_0 = arith.constant 0 : i32
    return %arg0, %c0_i32, %arg1 : i32, i32, i32
  }
  func.func @transform_1(%arg0: i32, %arg1: i32, %arg2: memref<2xf32, #tpu.memory_space<smem>>) -> (i32, i32) {
    %c0_i32 = arith.constant 0 : i32
    %c0_i32_0 = arith.constant 0 : i32
    %c0_i32_1 = arith.constant 0 : i32
    return %c0_i32, %c0_i32_0 : i32, i32
  }
  func.func @transform_2(%arg0: i32, %arg1: i32, %arg2: memref<2xf32, #tpu.memory_space<smem>>) -> (i32, i32) {
    %c0_i32 = arith.constant 0 : i32
    %c0_i32_0 = arith.constant 0 : i32
    %c0_i32_1 = arith.constant 0 : i32
    return %c0_i32, %c0_i32_0 : i32, i32
  }
  func.func @transform_3(%arg0: i32, %arg1: i32, %arg2: memref<2xf32, #tpu.memory_space<smem>>) -> (i32, i32) {
    %c0_i32 = arith.constant 0 : i32
    %c0_i32_0 = arith.constant 0 : i32
    %c0_i32_1 = arith.constant 0 : i32
    return %c0_i32, %c0_i32_0 : i32, i32
  }
  func.func @transform_4(%arg0: i32, %arg1: i32, %arg2: memref<2xf32, #tpu.memory_space<smem>>) -> (i32, i32) {
    %c0_i32 = arith.constant 0 : i32
    %c0_i32_0 = arith.constant 0 : i32
    %c0_i32_1 = arith.constant 0 : i32
    return %c0_i32, %c0_i32_0 : i32, i32
  }
  func.func @transform_5(%arg0: i32, %arg1: i32, %arg2: memref<2xf32, #tpu.memory_space<smem>>) -> (i32, i32) {
    %c0_i32 = arith.constant 0 : i32
    %c0_i32_0 = arith.constant 0 : i32
    %c0_i32_1 = arith.constant 0 : i32
    return %c0_i32, %c0_i32_0 : i32, i32
  }
  func.func @transform_6(%arg0: i32, %arg1: i32, %arg2: memref<2xf32, #tpu.memory_space<smem>>) -> (i32, i32) {
    %c0_i32 = arith.constant 0 : i32
    %c0_i32_0 = arith.constant 0 : i32
    %c0_i32_1 = arith.constant 0 : i32
    return %c0_i32, %c0_i32_0 : i32, i32
  }
  func.func @transform_7(%arg0: i32, %arg1: i32, %arg2: memref<2xf32, #tpu.memory_space<smem>>) -> (i32, i32, i32) {
    %c0_i32 = arith.constant 0 : i32
    %c0_i32_0 = arith.constant 0 : i32
    return %arg0, %c0_i32, %arg1 : i32, i32, i32
  }
}

module attributes {stable_mosaic.version = 11 : i64} {
  func.func @kernel(%arg0: i32, %arg1: i32, %arg2: memref<2xf32, #tpu.memory_space<smem>>, %arg3: memref<1x16x128xf32, #tpu.memory_space<vmem>>, %arg4: memref<32x16xf32, #tpu.memory_space<vmem>>, %arg5: memref<32x1xf32, #tpu.memory_space<vmem>>, %arg6: memref<33x32xf32, #tpu.memory_space<vmem>>, %arg7: memref<33x1xf32, #tpu.memory_space<vmem>>, %arg8: memref<32x1xf32, #tpu.memory_space<vmem>>, %arg9: memref<32x1xf32, #tpu.memory_space<vmem>>, %arg10: memref<1x32x128xf32, #tpu.memory_space<vmem>>) attributes {dimension_semantics = [#tpu.dimension_semantics<parallel>, #tpu.dimension_semantics<parallel>], iteration_bounds = array<i64: 1, 1>, scalar_prefetch = 1 : i64, scratch_operands = 0 : i64, tpu.core_type = #tpu.core_type<tc>, window_params = [{transform_indices = @transform_0, window_bounds = array<i64: 1, 16, 128>}, {pipeline_mode = #tpu.pipeline_mode<synchronous>, transform_indices = @transform_1, window_bounds = array<i64: 32, 16>}, {pipeline_mode = #tpu.pipeline_mode<synchronous>, transform_indices = @transform_2, window_bounds = array<i64: 32, 1>}, {pipeline_mode = #tpu.pipeline_mode<synchronous>, transform_indices = @transform_3, window_bounds = array<i64: 33, 32>}, {pipeline_mode = #tpu.pipeline_mode<synchronous>, transform_indices = @transform_4, window_bounds = array<i64: 33, 1>}, {pipeline_mode = #tpu.pipeline_mode<synchronous>, transform_indices = @transform_5, window_bounds = array<i64: 32, 1>}, {pipeline_mode = #tpu.pipeline_mode<synchronous>, transform_indices = @transform_6, window_bounds = array<i64: 32, 1>}, {transform_indices = @transform_7, window_bounds = array<i64: 1, 32, 128>}]} {
    %c0 = arith.constant 0 : index
    %c0_0 = arith.constant 0 : index
    %c0_1 = arith.constant 0 : index
    %0 = vector.load %arg3[%c0, %c0_0, %c0_1] : memref<1x16x128xf32, #tpu.memory_space<vmem>>, vector<1x16x128xf32>
    %1 = vector.shape_cast %0 : vector<1x16x128xf32> to vector<16x128xf32>
    %c0_2 = arith.constant 0 : index
    %c0_3 = arith.constant 0 : index
    %2 = vector.load %arg4[%c0_2, %c0_3] : memref<32x16xf32, #tpu.memory_space<vmem>>, vector<32x16xf32>
    %cst = arith.constant dense<0.000000e+00> : vector<32x128xf32>
    %3 = tpu.matmul %2, %1, %cst {dimension_numbers = #tpu.dot_dimension_numbers<[1], [0], [0], [1], [0, 0, 1, 1], [], []>} : vector<32x16xf32>, vector<16x128xf32>, vector<32x128xf32> -> vector<32x128xf32>
    %c0_4 = arith.constant 0 : index
    %c0_5 = arith.constant 0 : index
    %4 = vector.load %arg5[%c0_4, %c0_5] : memref<32x1xf32, #tpu.memory_space<vmem>>, vector<32x1xf32>
    %5 = vector.broadcast %4 : vector<32x1xf32> to vector<32x128xf32>
    %6 = arith.addf %3, %5 : vector<32x128xf32>
    %c0_6 = arith.constant 0 : index
    %7 = memref.load %arg2[%c0_6] : memref<2xf32, #tpu.memory_space<smem>>
    %cst_7 = arith.constant 0.000000e+00 : f32
    %8 = vector.broadcast %cst_7 : f32 to vector<32x128xf32>
    %9 = arith.cmpf oge, %6, %8 : vector<32x128xf32>
    %10 = vector.broadcast %7 : f32 to vector<32x128xf32>
    %11 = arith.mulf %10, %6 : vector<32x128xf32>
    %12 = arith.select %9, %6, %11 : vector<32x128xi1>, vector<32x128xf32>
    %c0_8 = arith.constant 0 : index
    %c0_9 = arith.constant 0 : index
    %13 = vector.load %arg6[%c0_8, %c0_9] : memref<33x32xf32, #tpu.memory_space<vmem>>, vector<33x32xf32>
    %c0_10 = arith.constant 0 : index
    %c0_11 = arith.constant 0 : index
    %14 = vector.load %arg7[%c0_10, %c0_11] : memref<33x1xf32, #tpu.memory_space<vmem>>, vector<33x1xf32>
    %c0_12 = arith.constant 0 : index
    %c0_13 = arith.constant 0 : index
    %15 = vector.load %arg8[%c0_12, %c0_13] : memref<32x1xf32, #tpu.memory_space<vmem>>, vector<32x1xf32>
    %c0_14 = arith.constant 0 : index
    %c0_15 = arith.constant 0 : index
    %16 = vector.load %arg9[%c0_14, %c0_15] : memref<32x1xf32, #tpu.memory_space<vmem>>, vector<32x1xf32>
    %c1 = arith.constant 1 : index
    %17 = memref.load %arg2[%c1] : memref<2xf32, #tpu.memory_space<smem>>
    %cst_16 = arith.constant dense<0.000000e+00> : vector<33x128xf32>
    %18 = tpu.matmul %13, %12, %cst_16 {dimension_numbers = #tpu.dot_dimension_numbers<[1], [0], [0], [1], [0, 0, 1, 1], [], []>} : vector<33x32xf32>, vector<32x128xf32>, vector<33x128xf32> -> vector<33x128xf32>
    %19 = vector.broadcast %14 : vector<33x1xf32> to vector<33x128xf32>
    %20 = arith.addf %18, %19 : vector<33x128xf32>
    %21 = vector.extract_strided_slice %20 {offsets = [0, 0], sizes = [32, 128], strides = [1, 1]} : vector<33x128xf32> to vector<32x128xf32>
    %22 = vector.extract_strided_slice %20 {offsets = [32, 0], sizes = [1, 128], strides = [1, 1]} : vector<33x128xf32> to vector<1x128xf32>
    %23 = arith.mulf %21, %21 : vector<32x128xf32>
    %cst_17 = arith.constant dense<0.000000e+00> : vector<128xf32>
    %24 = vector.multi_reduction <add>, %23, %cst_17 [0] : vector<32x128xf32> to vector<128xf32>
    %25 = vector.shape_cast %24 : vector<128xf32> to vector<1x128xf32>
    %cst_18 = arith.constant 3.200000e+01 : f32
    %26 = vector.broadcast %cst_18 : f32 to vector<1x128xf32>
    %27 = arith.divf %25, %26 : vector<1x128xf32>
    %28 = arith.mulf %22, %22 : vector<1x128xf32>
    %29 = arith.subf %27, %28 : vector<1x128xf32>
    %cst_19 = arith.constant 0.000000e+00 : f32
    %30 = vector.broadcast %cst_19 : f32 to vector<1x128xf32>
    %31 = arith.maximumf %29, %30 : vector<1x128xf32>
    %32 = math.sqrt %31 : vector<1x128xf32>
    %cst_20 = arith.constant 9.99999974E-5 : f32
    %33 = vector.broadcast %cst_20 : f32 to vector<1x128xf32>
    %34 = arith.addf %32, %33 : vector<1x128xf32>
    %35 = tpu.reciprocal %34 : vector<1x128xf32> -> vector<1x128xf32>
    %36 = vector.broadcast %22 : vector<1x128xf32> to vector<32x128xf32>
    %37 = arith.subf %21, %36 : vector<32x128xf32>
    %38 = vector.broadcast %35 : vector<1x128xf32> to vector<32x128xf32>
    %39 = arith.mulf %37, %38 : vector<32x128xf32>
    %40 = vector.broadcast %15 : vector<32x1xf32> to vector<32x128xf32>
    %41 = arith.mulf %40, %39 : vector<32x128xf32>
    %42 = vector.broadcast %16 : vector<32x1xf32> to vector<32x128xf32>
    %43 = arith.addf %41, %42 : vector<32x128xf32>
    %cst_21 = arith.constant 0.000000e+00 : f32
    %44 = vector.broadcast %cst_21 : f32 to vector<32x128xf32>
    %45 = arith.cmpf oge, %43, %44 : vector<32x128xf32>
    %46 = vector.broadcast %17 : f32 to vector<32x128xf32>
    %47 = arith.mulf %46, %43 : vector<32x128xf32>
    %48 = arith.select %45, %43, %47 : vector<32x128xi1>, vector<32x128xf32>
    %c0_22 = arith.constant 0 : index
    %c0_23 = arith.constant 0 : index
    %c0_24 = arith.constant 0 : index
    %49 = vector.load %arg10[%c0_22, %c0_23, %c0_24] : memref<1x32x128xf32, #tpu.memory_space<vmem>>, vector<1x32x128xf32>
    %50 = vector.shape_cast %49 : vector<1x32x128xf32> to vector<32x128xf32>
    %51 = vector.shape_cast %48 : vector<32x128xf32> to vector<1x32x128xf32>
    tpu.vector_store %arg10[%c0_22, %c0_23, %c0_24], %51 {strides = array<i32>} : memref<1x32x128xf32, #tpu.memory_space<vmem>>, vector<1x32x128xf32>,
    return
  }
  func.func @transform_0(%arg0: i32, %arg1: i32, %arg2: memref<2xf32, #tpu.memory_space<smem>>) -> (i32, i32, i32) {
    %c0_i32 = arith.constant 0 : i32
    %c0_i32_0 = arith.constant 0 : i32
    return %arg0, %c0_i32, %arg1 : i32, i32, i32
  }
  func.func @transform_1(%arg0: i32, %arg1: i32, %arg2: memref<2xf32, #tpu.memory_space<smem>>) -> (i32, i32) {
    %c0_i32 = arith.constant 0 : i32
    %c0_i32_0 = arith.constant 0 : i32
    %c0_i32_1 = arith.constant 0 : i32
    return %c0_i32, %c0_i32_0 : i32, i32
  }
  func.func @transform_2(%arg0: i32, %arg1: i32, %arg2: memref<2xf32, #tpu.memory_space<smem>>) -> (i32, i32) {
    %c0_i32 = arith.constant 0 : i32
    %c0_i32_0 = arith.constant 0 : i32
    %c0_i32_1 = arith.constant 0 : i32
    return %c0_i32, %c0_i32_0 : i32, i32
  }
  func.func @transform_3(%arg0: i32, %arg1: i32, %arg2: memref<2xf32, #tpu.memory_space<smem>>) -> (i32, i32) {
    %c0_i32 = arith.constant 0 : i32
    %c0_i32_0 = arith.constant 0 : i32
    %c0_i32_1 = arith.constant 0 : i32
    return %c0_i32, %c0_i32_0 : i32, i32
  }
  func.func @transform_4(%arg0: i32, %arg1: i32, %arg2: memref<2xf32, #tpu.memory_space<smem>>) -> (i32, i32) {
    %c0_i32 = arith.constant 0 : i32
    %c0_i32_0 = arith.constant 0 : i32
    %c0_i32_1 = arith.constant 0 : i32
    return %c0_i32, %c0_i32_0 : i32, i32
  }
  func.func @transform_5(%arg0: i32, %arg1: i32, %arg2: memref<2xf32, #tpu.memory_space<smem>>) -> (i32, i32) {
    %c0_i32 = arith.constant 0 : i32
    %c0_i32_0 = arith.constant 0 : i32
    %c0_i32_1 = arith.constant 0 : i32
    return %c0_i32, %c0_i32_0 : i32, i32
  }
  func.func @transform_6(%arg0: i32, %arg1: i32, %arg2: memref<2xf32, #tpu.memory_space<smem>>) -> (i32, i32) {
    %c0_i32 = arith.constant 0 : i32
    %c0_i32_0 = arith.constant 0 : i32
    %c0_i32_1 = arith.constant 0 : i32
    return %c0_i32, %c0_i32_0 : i32, i32
  }
  func.func @transform_7(%arg0: i32, %arg1: i32, %arg2: memref<2xf32, #tpu.memory_space<smem>>) -> (i32, i32, i32) {
    %c0_i32 = arith.constant 0 : i32
    %c0_i32_0 = arith.constant 0 : i32
    return %arg0, %c0_i32, %arg1 : i32, i32, i32
  }
}

</mosaic_0001>

<bundles_post_ra>
// kernel: squeeze.1
= control target key start
LH: loop header
LB: loop body
LE: loop exit
PB: predicated region body
PF: predicated region fallthrough
CT: control target
= control target key end

     0   :  { %vm3_vm0 = vcmask 261120   ;;  %s53_s0 = inlined_call_operand.vmem [shape: f32[1,32,20], index: 0, kind: input, shape index: {}]   ;;  %s54_s1 = inlined_call_operand.vmem [shape: f32[32,2,10], index: 1, kind: output, shape index: {}]  }
   0x1   :  { %v2_v0 = vld [vmem:[%s53_s0] sm:$0xff]   ;;  %v17_v1 = vld [vmem:[%s53_s0 + $0x8] sm:$0xff]   ;;  %v20_v2 = vld [vmem:[%s53_s0 + $0x10] sm:$0xf]  }
   0x2   :  { %4 = vst.msk [vmem:[%s54_s1] sm:$0xff] %vm3_vm0, %v2_v0   ;;  %18 = vst.msk [vmem:[%s54_s1 + $0x8] sm:$0x3] %vm3_vm0, %v17_v1  }
   0x3   :  { %19 = vst.msk [vmem:[%s54_s1 + $0xe] sm:$0xfc] %vm3_vm0, %v17_v1   ;;  %21 = vst.msk [vmem:[%s54_s1 + $0x16] sm:$0xf] %vm3_vm0, %v20_v2  }

// kernel: convnet_stage_forward.1
= control target key start
LH: loop header
LB: loop body
LE: loop exit
PB: predicated region body
PF: predicated region fallthrough
CT: control target
= control target key end

     0   :  { %s692_s0 = inlined_call_operand.vmem [shape: f32[2], index: 0, kind: input, shape index: {}]   ;;  %s693_s1 = inlined_call_operand.vmem [shape: f32[1,16,128], index: 1, kind: input, shape index: {}]   ;;  %s694_s2 = inlined_call_operand.vmem [shape: f32[32,16], index: 2, kind: input, shape index: {}]   ;;  %s695_s3 = inlined_call_operand.vmem [shape: f32[32,1], index: 3, kind: input, shape index: {}]   ;;  %s696_s4 = inlined_call_operand.vmem [shape: f32[33,32], index: 4, kind: input, shape index: {}]   ;;  %s697_s5 = inlined_call_operand.vmem [shape: f32[33,1], index: 5, kind: input, shape index: {}]   ;;  %s698_s6 = inlined_call_operand.vmem [shape: f32[32,1], index: 6, kind: input, shape index: {}]   ;;  %s699_s7 = inlined_call_operand.vmem [shape: f32[32,1], index: 7, kind: input, shape index: {}]   ;;  %s700_s8 = inlined_call_operand.vmem [shape: f32[1,32,128], index: 8, kind: output, shape index: {}]  }
   0x1   :  { %s13_s29 = sshll.u32 %s692_s0, 4  ;;  %s14_s29 = int_to_ptr.vmem [resolvable:$true] %s13_s29 }
   0x2   :  { %s520_s30 = scalar_lea.vmem %s14_s29, 16  ;;  %p525_p1 = scmp.lt.s32.totalorder %s14_s29, %s14_s29 }
   0x3   :  { %p521_p0 = scmp.ne.s32.totalorder %s14_s29, %s520_s30  ;;  %p526_p2 = scmp.lt.s32.totalorder %s520_s30, %s520_s30 }
   0x5   :  { %p527_p3 = por %p526_p2, %p525_p1 }
   0x7   :  { %p528_p4 = pnand %p527_p3, %p521_p0 }
   0x9   :  { %531 = shalt.err (!%p528_p4)  }
   0xa   :  { %s534_s9 = smov [#allocation3]  }
   0xb   :  { %16 = dma.vmem_to_smem %s14_s29, 16, %s534_s9, [#allocation2] }
   0xc   :  { %532 = dma.done.wait [#allocation2], 16 }
   0xd   :  { %533 = vsyncadd [#allocation2], 4294967280 }
   0xe   :  { %18 = sfence }
   0xf   :  { %v33_v0 = vld [vmem:[%s693_s1] sm:$0xff]  ;;  %v34_v1 = vld [vmem:[%s693_s1 + $0x8] sm:$0xff]  ;;  %vm63_vm0 = vcmask 130048   ;;  %v535_v4 = vmov 0   ;;  %v41_v6 = vld [vmem:[%s695_s3 + $0x10] sm:$0xff]  ;;  %v536_v25 = vmov 0.0|0.0   ;;  %v352_v57 = vlaneseq }
  0x10   :  { %v35_v2 = vld [vmem:[%s694_s2] sm:$0xff]  ;;  %v495_v3 = vpack.c.bf16 %v34_v1, %v33_v0  ;;  %514 = vset.pattern.permute.xlu0 %v535_v4  ;;  %515 = vset.pattern.permute.xlu1 %v535_v4  ;;  %v36_v7 = vld [vmem:[%s694_s2 + $0x8] sm:$0xff]  ;;  %v37_v9 = vld [vmem:[%s694_s2 + $0x10] sm:$0xff]  ;;  %vm537_vm1 = vmmov 0   ;;  %v538_v26 = vmov 0.0   ;;  %vm219_vm6 = vcmask 261120  }
  0x11   :  { %466 = vmatprep.mubr.msk.f32.mxu0 %vm63_vm0, %v35_v2  ;;  %v39_v5 = vld [vmem:[%s695_s3] sm:$0xff]  ;;  %v40_v8 = vld [vmem:[%s695_s3 + $0x8] sm:$0xff]  ;;  %55 = vperm.xlu1 %515, %v41_v6   ;;  %v42_v10 = vld [vmem:[%s695_s3 + $0x18] sm:$0xff]  ;;  %v353_v0 = vshrl.u32 %v352_v57, 7 }
  0x12   :  { %496 = vmatprep.subr.bf16.mxu0 %v495_v3  ;;  %45 = vperm.xlu0 %514, %v39_v5   ;;  %v38_v11 = vld [vmem:[%s694_s2 + $0x18] sm:$0xff]  ;;  %v180_v12 = vld [vmem:[%s697_s5] sm:$0xff]  ;;  %v181_v13 = vld [vmem:[%s697_s5 + $0x8] sm:$0xff] }
  0x13   :  { %498 = vmatpush3.bf16.msra.mxu0 %v495_v3  ;;  %v182_v14 = vld [vmem:[%s697_s5 + $0x10] sm:$0xff]  ;;  %v183_v15 = vld [vmem:[%s697_s5 + $0x18] sm:$0xff]  ;;  %v184_v16 = vld [vmem:[%s697_s5 + $0x20] sm:$0x1]  ;;  %505 = vmatprep.subr.bf16.mxu1 %v536_v25 }
  0x14   :  { %v185_v17 = vld [vmem:[%s698_s6] sm:$0xff]  ;;  %v186_v18 = vld [vmem:[%s698_s6 + $0x8] sm:$0xff]  ;;  %v187_v19 = vld [vmem:[%s698_s6 + $0x10] sm:$0xff]  ;;  %499 = vmatprep.subr.bf16.mxu0 %v536_v25  ;;  %486 = vmatprep.mubr.msk.f32.mxu1 %vm537_vm1, %v538_v26 }
  0x15   :  { %60 = vperm.xlu1 %515, %v42_v10   ;;  %v188_v20 = vld [vmem:[%s698_s6 + $0x18] sm:$0xff]  ;;  %v189_v21 = vld [vmem:[%s699_s7] sm:$0xff]  ;;  %v190_v22 = vld [vmem:[%s699_s7 + $0x8] sm:$0xff]  ;;  %s161_s6 = sld [smem:[#allocation3]] }
  0x16   :  { %467 = vmatmul.mubr.msk.f32.vlgmr.msra.gmra.mrb[0].mxu0 %vm63_vm0, %v36_v7  ;;  %50 = vperm.xlu0 %514, %v40_v8   ;;  %v191_v23 = vld [vmem:[%s699_s7 + $0x10] sm:$0xff]  ;;  %v192_v24 = vld [vmem:[%s699_s7 + $0x18] sm:$0xff]  ;;  %v175_v50 = vld [vmem:[%s696_s4] sm:$0xff] }
  0x17   :  { %469 = vmatprep.mubr.msk.f32.mxu0 %vm63_vm0, %v37_v9  ;;  %v177_v51 = vld [vmem:[%s696_s4 + $0x10] sm:$0xff]  ;;  %v176_v52 = vld [vmem:[%s696_s4 + $0x8] sm:$0xff]  ;;  %v178_v53 = vld [vmem:[%s696_s4 + $0x18] sm:$0xff] }
  0x18   :  { %v179_v54 = vld [vmem:[%s696_s4 + $0x20] sm:$0x1]  ;;  %s441_s4 = sld [smem:[#allocation3 + $0x1]] }
  0x19   :  { %201 = vperm.xlu1 %515, %v181_v13  }
  0x1a   :  { %470 = vmatmul.mubr.msk.f32.gmra.mrb[2].mxu0 %vm63_vm0, %v38_v11  ;;  %196 = vperm.xlu0 %514, %v180_v12   ;;  %v354_v11 = vsub.s32 0, %v353_v0 }
  0x1b   :  { %480 = vmatprep.mubr.msk.f32.mxu0 %vm537_vm1, %v538_v26  ;;  %v166_v31 = vstv %s161_s6 }
  0x1d   :  { %211 = vperm.xlu1 %515, %v183_v15  }
  0x1e   :  { %206 = vperm.xlu0 %514, %v182_v14  }
  0x21   :  { %370 = vperm.xlu1 %515, %v185_v17  }
  0x22   :  { %216 = vperm.xlu0 %514, %v184_v16  }
  0x25   :  { %380 = vperm.xlu1 %515, %v187_v19  }
  0x26   :  { %375 = vperm.xlu0 %514, %v186_v18  }
  0x29   :  { %394 = vperm.xlu1 %515, %v189_v21  }
  0x2a   :  { %385 = vperm.xlu0 %514, %v188_v20  }
  0x2d   :  { %404 = vperm.xlu1 %515, %v191_v23  }
  0x2e   :  { %399 = vperm.xlu0 %514, %v190_v22  }
  0x32   :  { %409 = vperm.xlu0 %514, %v192_v24  }
  0x90   :  { %v56_v28 = vpop.permute.xlu1 %55 }
  0x91   :  { %v46_v27 = vpop.permute.xlu0 %45 }
  0x94   :  { %v61_v36 = vpop.permute.xlu1 %60 }
  0x95   :  { %v51_v29 = vpop.permute.xlu0 %50 }
  0x98   :  { %v202_v56 = vpop.permute.xlu1 %201 }
  0x99   :  { %v197_v55 = vpop.permute.xlu0 %196 }
  0x9c   :  { %v212_v7 = vpop.permute.xlu1 %211 }
  0x9d   :  { %v207_v62 = vpop.permute.xlu0 %206 }
  0xa1   :  { %v217_v12 = vpop.permute.xlu0 %216 }
  0xe9   :  { %v468_v30 = vpop.f32.mrb[0].mxu0 }
  0xea   :  { %v148_v32 = vadd.f32 %v468_v30, %v51_v29  ;;  %v142_v33 = vpop.f32.mrb[1].mxu0 }
  0xeb   :  { %v143_v34 = vadd.f32 %v142_v33, %v46_v27 }
  0xec   :  { %vm163_vm2 = vcmp.ge.f32.partialorder %v148_v32, 0.0  ;;  %v168_v35 = vmul.f32 %v166_v31, %v148_v32 }
  0xed   :  { %vm162_vm3 = vcmp.ge.f32.partialorder %v143_v34, 0.0  ;;  %v167_v37 = vmul.f32 %v166_v31, %v143_v34  ;;  %v471_v38 = vpop.f32.mrb[2].mxu0 }
  0xee   :  { %v172_v39 = vsel %vm163_vm2, %v148_v32, %v168_v35  ;;  %v158_v40 = vadd.f32 %v471_v38, %v61_v36  ;;  %v152_v41 = vpop.f32.mrb[3].mxu0 }
  0xef   :  { %v171_v42 = vsel %vm162_vm3, %v143_v34, %v167_v37  ;;  %v153_v43 = vadd.f32 %v152_v41, %v56_v28  ;;  %v376_v41 = vpop.permute.xlu0 %375 }
  0xf0   :  { %v500_v44 = vpack.c.bf16 %v172_v39, %v171_v42  ;;  %vm165_vm4 = vcmp.ge.f32.partialorder %v158_v40, 0.0  ;;  %v170_v45 = vmul.f32 %v166_v31, %v158_v40  ;;  %v371_v42 = vpop.permute.xlu1 %370 }
  0xf1   :  { %vm164_vm5 = vcmp.ge.f32.partialorder %v153_v43, 0.0  ;;  %v169_v46 = vmul.f32 %v166_v31, %v153_v43 }
  0xf2   :  { %v174_v47 = vsel %vm165_vm4, %v158_v40, %v170_v45  ;;  %501 = vmatpush3.bf16.msra.mxu0 %v500_v44  ;;  %507 = vmatpush3.bf16.msra.mxu1 %v500_v44 }
  0xf3   :  { %v173_v48 = vsel %vm164_vm5, %v153_v43, %v169_v46  ;;  %502 = vmatprep.subr.bf16.mxu0 %v536_v25  ;;  %506 = vmatprep.subr.bf16.mxu1 %v536_v25  ;;  %v386_v44 = vpop.permute.xlu0 %385 }
  0xf4   :  { %v503_v49 = vpack.c.bf16 %v174_v47, %v173_v48  ;;  %v381_v45 = vpop.permute.xlu1 %380 }
  0xf6   :  { %504 = vmatpush3.bf16.msra.mxu0 %v503_v49  ;;  %508 = vmatpush3.bf16.msra.mxu1 %v503_v49 }
  0xf7   :  { %v400_v47 = vpop.permute.xlu0 %399 }
  0xf8   :  { %v395_v48 = vpop.permute.xlu1 %394 }
  0xf9   :  { %481 = vmatmul.mubr.msk.f32.vlgmr.msra.gmra.mrb[4].mxu0 %vm219_vm6, %v175_v50  ;;  %487 = vmatmul.mubr.msk.f32.vlgmr.msra.gmra.mrb[0].mxu1 %vm219_vm6, %v177_v51 }
  0xfa   :  { %483 = vmatprep.mubr.msk.f32.mxu0 %vm537_vm1, %v538_v26  ;;  %489 = vmatprep.mubr.msk.f32.mxu1 %vm537_vm1, %v538_v26 }
  0xfd   :  { %484 = vmatmul.mubr.msk.f32.gmra.mrb[6].mxu0 %vm219_vm6, %v176_v52  ;;  %490 = vmatmul.mubr.msk.f32.gmra.mrb[2].mxu1 %vm219_vm6, %v178_v53 }
  0xfe   :  { %492 = vmatprep.mubr.msk.f32.mxu1 %vm537_vm1, %v538_v26 }
 0x101   :  { %493 = vmatmul.mubr.msk.f32.gmra.mrb[4].mxu1 %vm219_vm6, %v179_v54 }
 0x1cc   :  { %v301_v58 = vpop.f32.mrb[4].mxu0  ;;  %v311_v59 = vpop.f32.mrb[0].mxu1 }
 0x1cd   :  { %v482_v60 = vpop.f32.mrb[5].mxu0  ;;  %v488_v61 = vpop.f32.mrb[1].mxu1  ;;  %v302_v63 = vadd.f32 %v301_v58, %v197_v55  ;;  %v312_v3 = vadd.f32 %v311_v59, %v207_v62 }
 0x1ce   :  { %v410_v58 = vpop.permute.xlu0 %409  ;;  %v405_v59 = vpop.permute.xlu1 %404  ;;  %v420_v60 = vstv %s441_s4 }
 0x1cf   :  { %v325_v8 = vmul.f32 %v302_v63, %v302_v63  ;;  %v327_v14 = vmul.f32 %v312_v3, %v312_v3 }
 0x1d0   :  { %v306_v1 = vpop.f32.mrb[6].mxu0  ;;  %v316_v2 = vpop.f32.mrb[2].mxu1 }
 0x1d1   :  { %v307_v4 = vadd.f32 %v306_v1, %v202_v56  ;;  %v485_v5 = vpop.f32.mrb[7].mxu0  ;;  %v491_v6 = vpop.f32.mrb[3].mxu1  ;;  %v317_v10 = vadd.f32 %v316_v2, %v212_v7 }
 0x1d3   :  { %v326_v9 = vmul.f32 %v307_v4, %v307_v4  ;;  %v328_v18 = vmul.f32 %v317_v10, %v317_v10 }
 0x1d4   :  { %v321_v13 = vpop.f32.mrb[4].mxu1 }
 0x1d5   :  { %v329_v15 = vadd.f32 %v326_v9, %v325_v8  ;;  %v322_v16 = vadd.f32 %v321_v13, %v217_v12  ;;  %v494_v17 = vpop.f32.mrb[5].mxu1 }
 0x1d7   :  { %v330_v19 = vadd.f32 %v329_v15, %v327_v14  ;;  %v355_v20 = vrot.slane %v322_v16, %v354_v11  ;;  %v340_v33 = vmul.f32 %v322_v16, %v322_v16 }
 0x1d9   :  { %v331_v21 = vadd.f32 %v330_v19, %v328_v18  ;;  %v356_v22 = vsub.f32 %v302_v63, %v355_v20  ;;  %v357_v23 = vsub.f32 %v307_v4, %v355_v20  ;;  %v358_v24 = vsub.f32 %v312_v3, %v355_v20 }
 0x1da   :  { %v359_v25 = vsub.f32 %v317_v10, %v355_v20 }
 0x1db   :  { %v332_v26 = vrot.slane %v331_v21, 4 }
 0x1dd   :  { %v333_v27 = vadd.f32 %v332_v26, %v331_v21 }
 0x1df   :  { %v334_v28 = vrot.slane %v333_v27, 2 }
 0x1e1   :  { %v335_v29 = vadd.f32 %v334_v28, %v333_v27 }
 0x1e3   :  { %v336_v30 = vrot.slane %v335_v29, 1 }
 0x1e5   :  { %v337_v31 = vadd.f32 %v336_v30, %v335_v29 }
 0x1e7   :  { %v339_v32 = vmul.f32 0.03125, %v337_v31 }
 0x1e9   :  { %v341_v34 = vsub.f32 %v339_v32, %v340_v33 }
 0x1eb   :  { %v342_v35 = vmax.f32 %v341_v34, 0.0 }
 0x1ed   :  { %516 = vrsqrt.f32 %v342_v35  ;;  %vm345_vm7 = vcmp.eq.f32.partialorder %v342_v35, inf  ;;  %v348_v38 = vand.u32 2147483648, %v342_v35  ;;  %vm347_vm8 = vcmp.eq.f32.partialorder %v342_v35, 0.0 }
 0x1f7   :  { %v517_v36 = vpop.eup %516 }
 0x1f8   :  { %v344_v37 = vmul.f32 %v517_v36, %v342_v35 }
 0x1fa   :  { %v346_v39 = vsel %vm345_vm7, %v342_v35, %v344_v37 }
 0x1fb   :  { %v349_v40 = vsel %vm347_vm8, %v348_v38, %v346_v39 }
 0x1fc   :  { %v350_v43 = vadd.f32 0.0001, %v349_v40 }
 0x1fe   :  { %518 = vrcp.f32 %v350_v43 }
 0x208   :  { %v519_v46 = vpop.eup %518 }
 0x209   :  { %v363_v49 = vrot.slane %v519_v46, %v354_v11 }
 0x20b   :  { %v364_v50 = vmul.f32 %v363_v49, %v356_v22  ;;  %v365_v51 = vmul.f32 %v363_v49, %v357_v23  ;;  %v366_v52 = vmul.f32 %v363_v49, %v358_v24  ;;  %v367_v53 = vmul.f32 %v363_v49, %v359_v25 }
 0x20d   :  { %v388_v54 = vmul.f32 %v371_v42, %v364_v50  ;;  %v389_v55 = vmul.f32 %v376_v41, %v365_v51  ;;  %v390_v56 = vmul.f32 %v381_v45, %v366_v52  ;;  %v391_v57 = vmul.f32 %v386_v44, %v367_v53 }
 0x20f   :  { %v412_v61 = vadd.f32 %v395_v48, %v388_v54  ;;  %v413_v62 = vadd.f32 %v400_v47, %v389_v55  ;;  %v414_v63 = vadd.f32 %v405_v59, %v390_v56  ;;  %v415_v0 = vadd.f32 %v410_v58, %v391_v57 }
 0x211   :  { %vm416_vm9 = vcmp.ge.f32.partialorder %v412_v61, 0.0  ;;  %vm417_vm10 = vcmp.ge.f32.partialorder %v413_v62, 0.0  ;;  %vm418_vm11 = vcmp.ge.f32.partialorder %v414_v63, 0.0  ;;  %vm419_vm12 = vcmp.ge.f32.partialorder %v415_v0, 0.0 }
 0x212   :  { %v421_v1 = vmul.f32 %v420_v60, %v412_v61  ;;  %v422_v2 = vmul.f32 %v420_v60, %v413_v62  ;;  %v423_v3 = vmul.f32 %v420_v60, %v414_v63  ;;  %v424_v4 = vmul.f32 %v420_v60, %v415_v0 }
 0x214   :  { %v425_v5 = vsel %vm416_vm9, %v412_v61, %v421_v1  ;;  %v426_v6 = vsel %vm417_vm10, %v413_v62, %v422_v2  ;;  %v427_v7 = vsel %vm418_vm11, %v414_v63, %v423_v3  ;;  %v428_v8 = vsel %vm419_vm12, %v415_v0, %v424_v4 }
 0x215   :  { %429 = vst [vmem:[%s700_s8] sm:$0xff] %v425_v5  ;;  %430 = vst [vmem:[%s700_s8 + $0x8] sm:$0xff] %v426_v6 }
 0x216   :  { %431 = vst [vmem:[%s700_s8 + $0x10] sm:$0xff] %v427_v7  ;;  %432 = vst [vmem:[%s700_s8 + $0x18] sm:$0xff] %v428_v8 }

// kernel: squeeze.1
= control target key start
LH: loop header
LB: loop body
LE: loop exit
PB: predicated region body
PF: predicated region fallthrough
CT: control target
= control target key end

     0   :  { %vm3_vm0 = vcmask 261120   ;;  %s53_s0 = inlined_call_operand.vmem [shape: f32[1,32,20], index: 0, kind: input, shape index: {}]   ;;  %s54_s1 = inlined_call_operand.vmem [shape: f32[32,2,10], index: 1, kind: output, shape index: {}]  }
   0x1   :  { %v2_v0 = vld [vmem:[%s53_s0] sm:$0xff]   ;;  %v17_v1 = vld [vmem:[%s53_s0 + $0x8] sm:$0xff]   ;;  %v20_v2 = vld [vmem:[%s53_s0 + $0x10] sm:$0xf]  }
   0x2   :  { %4 = vst.msk [vmem:[%s54_s1] sm:$0xff] %vm3_vm0, %v2_v0   ;;  %18 = vst.msk [vmem:[%s54_s1 + $0x8] sm:$0x3] %vm3_vm0, %v17_v1  }
   0x3   :  { %19 = vst.msk [vmem:[%s54_s1 + $0xe] sm:$0xfc] %vm3_vm0, %v17_v1   ;;  %21 = vst.msk [vmem:[%s54_s1 + $0x16] sm:$0xf] %vm3_vm0, %v20_v2  }

// kernel: convnet_stage_forward.1
= control target key start
LH: loop header
LB: loop body
LE: loop exit
PB: predicated region body
PF: predicated region fallthrough
CT: control target
= control target key end

     0   :  { %s692_s0 = inlined_call_operand.vmem [shape: f32[2], index: 0, kind: input, shape index: {}]   ;;  %s693_s1 = inlined_call_operand.vmem [shape: f32[1,16,128], index: 1, kind: input, shape index: {}]   ;;  %s694_s2 = inlined_call_operand.vmem [shape: f32[32,16], index: 2, kind: input, shape index: {}]   ;;  %s695_s3 = inlined_call_operand.vmem [shape: f32[32,1], index: 3, kind: input, shape index: {}]   ;;  %s696_s4 = inlined_call_operand.vmem [shape: f32[33,32], index: 4, kind: input, shape index: {}]   ;;  %s697_s5 = inlined_call_operand.vmem [shape: f32[33,1], index: 5, kind: input, shape index: {}]   ;;  %s698_s6 = inlined_call_operand.vmem [shape: f32[32,1], index: 6, kind: input, shape index: {}]   ;;  %s699_s7 = inlined_call_operand.vmem [shape: f32[32,1], index: 7, kind: input, shape index: {}]   ;;  %s700_s8 = inlined_call_operand.vmem [shape: f32[1,32,128], index: 8, kind: output, shape index: {}]  }
   0x1   :  { %s13_s29 = sshll.u32 %s692_s0, 4  ;;  %s14_s29 = int_to_ptr.vmem [resolvable:$true] %s13_s29 }
   0x2   :  { %s520_s30 = scalar_lea.vmem %s14_s29, 16  ;;  %p525_p1 = scmp.lt.s32.totalorder %s14_s29, %s14_s29 }
   0x3   :  { %p521_p0 = scmp.ne.s32.totalorder %s14_s29, %s520_s30  ;;  %p526_p2 = scmp.lt.s32.totalorder %s520_s30, %s520_s30 }
   0x5   :  { %p527_p3 = por %p526_p2, %p525_p1 }
   0x7   :  { %p528_p4 = pnand %p527_p3, %p521_p0 }
   0x9   :  { %531 = shalt.err (!%p528_p4)  }
   0xa   :  { %s534_s9 = smov [#allocation3]  }
   0xb   :  { %16 = dma.vmem_to_smem %s14_s29, 16, %s534_s9, [#allocation2] }
   0xc   :  { %532 = dma.done.wait [#allocation2], 16 }
   0xd   :  { %533 = vsyncadd [#allocation2], 4294967280 }
   0xe   :  { %18 = sfence }
   0xf   :  { %v33_v0 = vld [vmem:[%s693_s1] sm:$0xff]  ;;  %v34_v1 = vld [vmem:[%s693_s1 + $0x8] sm:$0xff]  ;;  %vm63_vm0 = vcmask 130048   ;;  %v535_v4 = vmov 0   ;;  %v41_v6 = vld [vmem:[%s695_s3 + $0x10] sm:$0xff]  ;;  %v536_v25 = vmov 0.0|0.0   ;;  %v352_v57 = vlaneseq }
  0x10   :  { %v35_v2 = vld [vmem:[%s694_s2] sm:$0xff]  ;;  %v495_v3 = vpack.c.bf16 %v34_v1, %v33_v0  ;;  %514 = vset.pattern.permute.xlu0 %v535_v4  ;;  %515 = vset.pattern.permute.xlu1 %v535_v4  ;;  %v36_v7 = vld [vmem:[%s694_s2 + $0x8] sm:$0xff]  ;;  %v37_v9 = vld [vmem:[%s694_s2 + $0x10] sm:$0xff]  ;;  %vm537_vm1 = vmmov 0   ;;  %v538_v26 = vmov 0.0   ;;  %vm219_vm6 = vcmask 261120  }
  0x11   :  { %466 = vmatprep.mubr.msk.f32.mxu0 %vm63_vm0, %v35_v2  ;;  %v39_v5 = vld [vmem:[%s695_s3] sm:$0xff]  ;;  %v40_v8 = vld [vmem:[%s695_s3 + $0x8] sm:$0xff]  ;;  %55 = vperm.xlu1 %515, %v41_v6   ;;  %v42_v10 = vld [vmem:[%s695_s3 + $0x18] sm:$0xff]  ;;  %v353_v0 = vshrl.u32 %v352_v57, 7 }
  0x12   :  { %496 = vmatprep.subr.bf16.mxu0 %v495_v3  ;;  %45 = vperm.xlu0 %514, %v39_v5   ;;  %v38_v11 = vld [vmem:[%s694_s2 + $0x18] sm:$0xff]  ;;  %v180_v12 = vld [vmem:[%s697_s5] sm:$0xff]  ;;  %v181_v13 = vld [vmem:[%s697_s5 + $0x8] sm:$0xff] }
  0x13   :  { %498 = vmatpush3.bf16.msra.mxu0 %v495_v3  ;;  %v182_v14 = vld [vmem:[%s697_s5 + $0x10] sm:$0xff]  ;;  %v183_v15 = vld [vmem:[%s697_s5 + $0x18] sm:$0xff]  ;;  %v184_v16 = vld [vmem:[%s697_s5 + $0x20] sm:$0x1]  ;;  %505 = vmatprep.subr.bf16.mxu1 %v536_v25 }
  0x14   :  { %v185_v17 = vld [vmem:[%s698_s6] sm:$0xff]  ;;  %v186_v18 = vld [vmem:[%s698_s6 + $0x8] sm:$0xff]  ;;  %v187_v19 = vld [vmem:[%s698_s6 + $0x10] sm:$0xff]  ;;  %499 = vmatprep.subr.bf16.mxu0 %v536_v25  ;;  %486 = vmatprep.mubr.msk.f32.mxu1 %vm537_vm1, %v538_v26 }
  0x15   :  { %60 = vperm.xlu1 %515, %v42_v10   ;;  %v188_v20 = vld [vmem:[%s698_s6 + $0x18] sm:$0xff]  ;;  %v189_v21 = vld [vmem:[%s699_s7] sm:$0xff]  ;;  %v190_v22 = vld [vmem:[%s699_s7 + $0x8] sm:$0xff]  ;;  %s161_s6 = sld [smem:[#allocation3]] }
  0x16   :  { %467 = vmatmul.mubr.msk.f32.vlgmr.msra.gmra.mrb[0].mxu0 %vm63_vm0, %v36_v7  ;;  %50 = vperm.xlu0 %514, %v40_v8   ;;  %v191_v23 = vld [vmem:[%s699_s7 + $0x10] sm:$0xff]  ;;  %v192_v24 = vld [vmem:[%s699_s7 + $0x18] sm:$0xff]  ;;  %v175_v50 = vld [vmem:[%s696_s4] sm:$0xff] }
  0x17   :  { %469 = vmatprep.mubr.msk.f32.mxu0 %vm63_vm0, %v37_v9  ;;  %v177_v51 = vld [vmem:[%s696_s4 + $0x10] sm:$0xff]  ;;  %v176_v52 = vld [vmem:[%s696_s4 + $0x8] sm:$0xff]  ;;  %v178_v53 = vld [vmem:[%s696_s4 + $0x18] sm:$0xff] }
  0x18   :  { %v179_v54 = vld [vmem:[%s696_s4 + $0x20] sm:$0x1]  ;;  %s441_s4 = sld [smem:[#allocation3 + $0x1]] }
  0x19   :  { %201 = vperm.xlu1 %515, %v181_v13  }
  0x1a   :  { %470 = vmatmul.mubr.msk.f32.gmra.mrb[2].mxu0 %vm63_vm0, %v38_v11  ;;  %196 = vperm.xlu0 %514, %v180_v12   ;;  %v354_v11 = vsub.s32 0, %v353_v0 }
  0x1b   :  { %480 = vmatprep.mubr.msk.f32.mxu0 %vm537_vm1, %v538_v26  ;;  %v166_v31 = vstv %s161_s6 }
  0x1d   :  { %211 = vperm.xlu1 %515, %v183_v15  }
  0x1e   :  { %206 = vperm.xlu0 %514, %v182_v14  }
  0x21   :  { %370 = vperm.xlu1 %515, %v185_v17  }
  0x22   :  { %216 = vperm.xlu0 %514, %v184_v16  }
  0x25   :  { %380 = vperm.xlu1 %515, %v187_v19  }
  0x26   :  { %375 = vperm.xlu0 %514, %v186_v18  }
  0x29   :  { %394 = vperm.xlu1 %515, %v189_v21  }
  0x2a   :  { %385 = vperm.xlu0 %514, %v188_v20  }
  0x2d   :  { %404 = vperm.xlu1 %515, %v191_v23  }
  0x2e   :  { %399 = vperm.xlu0 %514, %v190_v22  }
  0x32   :  { %409 = vperm.xlu0 %514, %v192_v24  }
  0x90   :  { %v56_v28 = vpop.permute.xlu1 %55 }
  0x91   :  { %v46_v27 = vpop.permute.xlu0 %45 }
  0x94   :  { %v61_v36 = vpop.permute.xlu1 %60 }
  0x95   :  { %v51_v29 = vpop.permute.xlu0 %50 }
  0x98   :  { %v202_v56 = vpop.permute.xlu1 %201 }
  0x99   :  { %v197_v55 = vpop.permute.xlu0 %196 }
  0x9c   :  { %v212_v7 = vpop.permute.xlu1 %211 }
  0x9d   :  { %v207_v62 = vpop.permute.xlu0 %206 }
  0xa1   :  { %v217_v12 = vpop.permute.xlu0 %216 }
  0xe9   :  { %v468_v30 = vpop.f32.mrb[0].mxu0 }
  0xea   :  { %v148_v32 = vadd.f32 %v468_v30, %v51_v29  ;;  %v142_v33 = vpop.f32.mrb[1].mxu0 }
  0xeb   :  { %v143_v34 = vadd.f32 %v142_v33, %v46_v27 }
  0xec   :  { %vm163_vm2 = vcmp.ge.f32.partialorder %v148_v32, 0.0  ;;  %v168_v35 = vmul.f32 %v166_v31, %v148_v32 }
  0xed   :  { %vm162_vm3 = vcmp.ge.f32.partialorder %v143_v34, 0.0  ;;  %v167_v37 = vmul.f32 %v166_v31, %v143_v34  ;;  %v471_v38 = vpop.f32.mrb[2].mxu0 }
  0xee   :  { %v172_v39 = vsel %vm163_vm2, %v148_v32, %v168_v35  ;;  %v158_v40 = vadd.f32 %v471_v38, %v61_v36  ;;  %v152_v41 = vpop.f32.mrb[3].mxu0 }
  0xef   :  { %v171_v42 = vsel %vm162_vm3, %v143_v34, %v167_v37  ;;  %v153_v43 = vadd.f32 %v152_v41, %v56_v28  ;;  %v376_v41 = vpop.permute.xlu0 %375 }
  0xf0   :  { %v500_v44 = vpack.c.bf16 %v172_v39, %v171_v42  ;;  %vm165_vm4 = vcmp.ge.f32.partialorder %v158_v40, 0.0  ;;  %v170_v45 = vmul.f32 %v166_v31, %v158_v40  ;;  %v371_v42 = vpop.permute.xlu1 %370 }
  0xf1   :  { %vm164_vm5 = vcmp.ge.f32.partialorder %v153_v43, 0.0  ;;  %v169_v46 = vmul.f32 %v166_v31, %v153_v43 }
  0xf2   :  { %v174_v47 = vsel %vm165_vm4, %v158_v40, %v170_v45  ;;  %501 = vmatpush3.bf16.msra.mxu0 %v500_v44  ;;  %507 = vmatpush3.bf16.msra.mxu1 %v500_v44 }
  0xf3   :  { %v173_v48 = vsel %vm164_vm5, %v153_v43, %v169_v46  ;;  %502 = vmatprep.subr.bf16.mxu0 %v536_v25  ;;  %506 = vmatprep.subr.bf16.mxu1 %v536_v25  ;;  %v386_v44 = vpop.permute.xlu0 %385 }
  0xf4   :  { %v503_v49 = vpack.c.bf16 %v174_v47, %v173_v48  ;;  %v381_v45 = vpop.permute.xlu1 %380 }
  0xf6   :  { %504 = vmatpush3.bf16.msra.mxu0 %v503_v49  ;;  %508 = vmatpush3.bf16.msra.mxu1 %v503_v49 }
  0xf7   :  { %v400_v47 = vpop.permute.xlu0 %399 }
  0xf8   :  { %v395_v48 = vpop.permute.xlu1 %394 }
  0xf9   :  { %481 = vmatmul.mubr.msk.f32.vlgmr.msra.gmra.mrb[4].mxu0 %vm219_vm6, %v175_v50  ;;  %487 = vmatmul.mubr.msk.f32.vlgmr.msra.gmra.mrb[0].mxu1 %vm219_vm6, %v177_v51 }
  0xfa   :  { %483 = vmatprep.mubr.msk.f32.mxu0 %vm537_vm1, %v538_v26  ;;  %489 = vmatprep.mubr.msk.f32.mxu1 %vm537_vm1, %v538_v26 }
  0xfd   :  { %484 = vmatmul.mubr.msk.f32.gmra.mrb[6].mxu0 %vm219_vm6, %v176_v52  ;;  %490 = vmatmul.mubr.msk.f32.gmra.mrb[2].mxu1 %vm219_vm6, %v178_v53 }
  0xfe   :  { %492 = vmatprep.mubr.msk.f32.mxu1 %vm537_vm1, %v538_v26 }
 0x101   :  { %493 = vmatmul.mubr.msk.f32.gmra.mrb[4].mxu1 %vm219_vm6, %v179_v54 }
 0x1cc   :  { %v301_v58 = vpop.f32.mrb[4].mxu0  ;;  %v311_v59 = vpop.f32.mrb[0].mxu1 }
 0x1cd   :  { %v482_v60 = vpop.f32.mrb[5].mxu0  ;;  %v488_v61 = vpop.f32.mrb[1].mxu1  ;;  %v302_v63 = vadd.f32 %v301_v58, %v197_v55  ;;  %v312_v3 = vadd.f32 %v311_v59, %v207_v62 }
 0x1ce   :  { %v410_v58 = vpop.permute.xlu0 %409  ;;  %v405_v59 = vpop.permute.xlu1 %404  ;;  %v420_v60 = vstv %s441_s4 }
 0x1cf   :  { %v325_v8 = vmul.f32 %v302_v63, %v302_v63  ;;  %v327_v14 = vmul.f32 %v312_v3, %v312_v3 }
 0x1d0   :  { %v306_v1 = vpop.f32.mrb[6].mxu0  ;;  %v316_v2 = vpop.f32.mrb[2].mxu1 }
 0x1d1   :  { %v307_v4 = vadd.f32 %v306_v1, %v202_v56  ;;  %v485_v5 = vpop.f32.mrb[7].mxu0  ;;  %v491_v6 = vpop.f32.mrb[3].mxu1  ;;  %v317_v10 = vadd.f32 %v316_v2, %v212_v7 }
 0x1d3   :  { %v326_v9 = vmul.f32 %v307_v4, %v307_v4  ;;  %v328_v18 = vmul.f32 %v317_v10, %v317_v10 }
 0x1d4   :  { %v321_v13 = vpop.f32.mrb[4].mxu1 }
 0x1d5   :  { %v329_v15 = vadd.f32 %v326_v9, %v325_v8  ;;  %v322_v16 = vadd.f32 %v321_v13, %v217_v12  ;;  %v494_v17 = vpop.f32.mrb[5].mxu1 }
 0x1d7   :  { %v330_v19 = vadd.f32 %v329_v15, %v327_v14  ;;  %v355_v20 = vrot.slane %v322_v16, %v354_v11  ;;  %v340_v33 = vmul.f32 %v322_v16, %v322_v16 }
 0x1d9   :  { %v331_v21 = vadd.f32 %v330_v19, %v328_v18  ;;  %v356_v22 = vsub.f32 %v302_v63, %v355_v20  ;;  %v357_v23 = vsub.f32 %v307_v4, %v355_v20  ;;  %v358_v24 = vsub.f32 %v312_v3, %v355_v20 }
 0x1da   :  { %v359_v25 = vsub.f32 %v317_v10, %v355_v20 }
 0x1db   :  { %v332_v26 = vrot.slane %v331_v21, 4 }
 0x1dd   :  { %v333_v27 = vadd.f32 %v332_v26, %v331_v21 }
 0x1df   :  { %v334_v28 = vrot.slane %v333_v27, 2 }
 0x1e1   :  { %v335_v29 = vadd.f32 %v334_v28, %v333_v27 }
 0x1e3   :  { %v336_v30 = vrot.slane %v335_v29, 1 }
 0x1e5   :  { %v337_v31 = vadd.f32 %v336_v30, %v335_v29 }
 0x1e7   :  { %v339_v32 = vmul.f32 0.03125, %v337_v31 }
 0x1e9   :  { %v341_v34 = vsub.f32 %v339_v32, %v340_v33 }
 0x1eb   :  { %v342_v35 = vmax.f32 %v341_v34, 0.0 }
 0x1ed   :  { %516 = vrsqrt.f32 %v342_v35  ;;  %vm345_vm7 = vcmp.eq.f32.partialorder %v342_v35, inf  ;;  %v348_v38 = vand.u32 2147483648, %v342_v35  ;;  %vm347_vm8 = vcmp.eq.f32.partialorder %v342_v35, 0.0 }
 0x1f7   :  { %v517_v36 = vpop.eup %516 }
 0x1f8   :  { %v344_v37 = vmul.f32 %v517_v36, %v342_v35 }
 0x1fa   :  { %v346_v39 = vsel %vm345_vm7, %v342_v35, %v344_v37 }
 0x1fb   :  { %v349_v40 = vsel %vm347_vm8, %v348_v38, %v346_v39 }
 0x1fc   :  { %v350_v43 = vadd.f32 0.0001, %v349_v40 }
 0x1fe   :  { %518 = vrcp.f32 %v350_v43 }
 0x208   :  { %v519_v46 = vpop.eup %518 }
 0x209   :  { %v363_v49 = vrot.slane %v519_v46, %v354_v11 }
 0x20b   :  { %v364_v50 = vmul.f32 %v363_v49, %v356_v22  ;;  %v365_v51 = vmul.f32 %v363_v49, %v357_v23  ;;  %v366_v52 = vmul.f32 %v363_v49, %v358_v24  ;;  %v367_v53 = vmul.f32 %v363_v49, %v359_v25 }
 0x20d   :  { %v388_v54 = vmul.f32 %v371_v42, %v364_v50  ;;  %v389_v55 = vmul.f32 %v376_v41, %v365_v51  ;;  %v390_v56 = vmul.f32 %v381_v45, %v366_v52  ;;  %v391_v57 = vmul.f32 %v386_v44, %v367_v53 }
 0x20f   :  { %v412_v61 = vadd.f32 %v395_v48, %v388_v54  ;;  %v413_v62 = vadd.f32 %v400_v47, %v389_v55  ;;  %v414_v63 = vadd.f32 %v405_v59, %v390_v56  ;;  %v415_v0 = vadd.f32 %v410_v58, %v391_v57 }
 0x211   :  { %vm416_vm9 = vcmp.ge.f32.partialorder %v412_v61, 0.0  ;;  %vm417_vm10 = vcmp.ge.f32.partialorder %v413_v62, 0.0  ;;  %vm418_vm11 = vcmp.ge.f32.partialorder %v414_v63, 0.0  ;;  %vm419_vm12 = vcmp.ge.f32.partialorder %v415_v0, 0.0 }
 0x212   :  { %v421_v1 = vmul.f32 %v420_v60, %v412_v61  ;;  %v422_v2 = vmul.f32 %v420_v60, %v413_v62  ;;  %v423_v3 = vmul.f32 %v420_v60, %v414_v63  ;;  %v424_v4 = vmul.f32 %v420_v60, %v415_v0 }
 0x214   :  { %v425_v5 = vsel %vm416_vm9, %v412_v61, %v421_v1  ;;  %v426_v6 = vsel %vm417_vm10, %v413_v62, %v422_v2  ;;  %v427_v7 = vsel %vm418_vm11, %v414_v63, %v423_v3  ;;  %v428_v8 = vsel %vm419_vm12, %v415_v0, %v424_v4 }
 0x215   :  { %429 = vst [vmem:[%s700_s8] sm:$0xff] %v425_v5  ;;  %430 = vst [vmem:[%s700_s8 + $0x8] sm:$0xff] %v426_v6 }
 0x216   :  { %431 = vst [vmem:[%s700_s8 + $0x10] sm:$0xff] %v427_v7  ;;  %432 = vst [vmem:[%s700_s8 + $0x18] sm:$0xff] %v428_v8 }

</bundles_post_ra>
